<compile_context>
chip_gen: v6e
topology: v6e:2x2x1
jax: 0.10.0
libtpu: 0.0.40
codegen_flags: <defaults>
</compile_context>

<pallas_src>
import jax
import jax.numpy as jnp
from jax.experimental import pallas as pl
from jax.experimental.pallas import tpu as pltpu


def _col_to_row(col):
    """Relayout an (N, 1) column of per-row scalars into a (1, N) row.

    Built only from broadcast / iota / select / axis-0 reduce, all of which
    lower unconditionally in Mosaic (a degenerate (N,1)->(1,N) transpose or
    reshape may not).  Cost: N*N selects + one sublane reduction -- negligible
    for N <= 512 and hidden under the block's HBM traffic.
    """
    n = col.shape[0]
    r = jax.lax.broadcasted_iota(jnp.int32, (n, n), 0)
    c = jax.lax.broadcasted_iota(jnp.int32, (n, n), 1)
    return jnp.sum(jnp.where(r == c, col, 0.0), axis=0, keepdims=True)   # (1, N)


def cwa_kernel(x_ref, w1_ref, b1_ref, w2_ref, b2_ref, out_ref):
    # x_ref: (TM, S) f32   w1: (S, D) bf16   b1: (1, D) f32
    # w2: (D, S) bf16      b2: (1, S) f32    out_ref: (1, TM) f32 (lane-dense)
    x = x_ref[...]                                       # (TM, S) f32
    xb = x.astype(jnp.bfloat16)                          # MXU-native operand

    # fc[0]: Linear(S, D) + ReLU   (Dropout p=0.0 is an identity)
    h1 = jnp.dot(xb, w1_ref[...], preferred_element_type=jnp.float32)    # MXU
    h1 = jnp.maximum(h1 + b1_ref[...], 0.0)              # (TM, D) f32

    # fc[3]: Linear(D, S)  (b2 varies along the softmax axis -> must be kept)
    logits = jnp.dot(h1.astype(jnp.bfloat16), w2_ref[...],
                     preferred_element_type=jnp.float32)                 # MXU
    logits = logits + b2_ref[...]                        # (TM, S) f32

    # Softmax over the spatial (lane) dim, folded into the pooled scalar:
    #   out = sum(x * e) / sum(e),  e = exp(logits - max)
    m = jnp.max(logits, axis=-1, keepdims=True)          # (TM, 1)
    e = jnp.exp(logits - m)                              # (TM, S), EUP
    num = jnp.sum(x * e, axis=-1, keepdims=True)         # (TM, 1), f32 pooling
    den = jnp.sum(e, axis=-1, keepdims=True)             # (TM, 1)

    out_ref[...] = _col_to_row(num / den)                # (1, TM) unmasked store


def _round_up(a, b):
    return ((a + b - 1) // b) * b


def channel_wise_attention(x, w1, b1, w2, b2, *, block_m=512):
    """x: (B, C, H, W) with H*W == w1.shape[0]. Returns (B, C, 1, 1) float32."""
    B, C, H, W = x.shape
    S = H * W
    assert w1.shape[0] == S, "ChannelWiseAttention requires in_channels == H*W"
    D = w1.shape[1]
    M = B * C

    xf = x.reshape(M, S).astype(jnp.float32)
    w1b = w1.astype(jnp.bfloat16)                # bf16 MXU operands, f32 accum
    w2b = w2.astype(jnp.bfloat16)
    b1f = b1.reshape(1, D).astype(jnp.float32)
    b2f = b2.reshape(1, S).astype(jnp.float32)

    # Row-block size: multiple of 128 (lane-dense output), large enough to
    # amortize the ~0.35us/step overhead, capped so the "parallel" row axis
    # keeps >= 2 blocks for v7x's two TensorCores when M allows it.
    tm = min(block_m, _round_up(M, 128), 1024)
    tm = max(128, (tm // 128) * 128)
    if M > 128:
        tm = min(tm, _round_up((M + 1) // 2, 128))
    Mp = _round_up(M, tm)
    if Mp != M:
        xf = jnp.pad(xf, ((0, Mp - M), (0, 0)))  # zero rows: finite, sliced off

    out = pl.pallas_call(
        cwa_kernel,
        out_shape=jax.ShapeDtypeStruct((1, Mp), jnp.float32),
        grid_spec=pltpu.PrefetchScalarGridSpec(
            num_scalar_prefetch=0,
            grid=(Mp // tm,),
            in_specs=[
                pl.BlockSpec((tm, S), lambda i: (i, 0)),   # activations, row-tiled
                pl.BlockSpec((S, D), lambda i: (0, 0)),    # W1 (bf16, VMEM-resident)
                pl.BlockSpec((1, D), lambda i: (0, 0)),    # b1
                pl.BlockSpec((D, S), lambda i: (0, 0)),    # W2 (bf16, VMEM-resident)
                pl.BlockSpec((1, S), lambda i: (0, 0)),    # b2
            ],
            out_specs=pl.BlockSpec((1, tm), lambda i: (0, i)),  # lane-dense row
        ),
        compiler_params=pltpu.CompilerParams(dimension_semantics=("parallel",)),
    )(xf, w1b, b1f, w2b, b2f)

    return out[0, :M].reshape(B, C, 1, 1)


def _reference(x, w1, b1, w2, b2):
    # Pure-JAX mirror of the PyTorch forward, full-f32 precision.
    B, C, H, W = x.shape
    S = H * W
    xf = x.reshape(B, C, S).astype(jnp.float32)
    h1 = jax.nn.relu(
        jnp.einsum("bcs,sd->bcd", xf, w1, precision=jax.lax.Precision.HIGHEST)
        + b1.reshape(1, 1, -1))
    logits = (jnp.einsum("bcd,ds->bcs", h1, w2, precision=jax.lax.Precision.HIGHEST)
              + b2.reshape(1, 1, -1))
    weights = jax.nn.softmax(logits, axis=2)
    return jnp.sum(xf * weights, axis=2).reshape(B, C, 1, 1)


if __name__ == "__main__":
    # Small shapes consistent with the module: B=2, C=4, H=W=16 so that
    # in_channels = H*W = 256, reduction_ratio = 4 -> hidden D = 64.
    B, C, H, W = 2, 4, 16, 16
    S = H * W          # in_channels = 256
    D = S // 4         # 64

    key = jax.random.PRNGKey(0)
    kx, kw1, kb1, kw2, kb2 = jax.random.split(key, 5)

    x = jax.random.normal(kx, (B, C, H, W), dtype=jnp.float32)

    # PyTorch-style init: uniform(-1/sqrt(fan_in), 1/sqrt(fan_in)).
    # Weights stored as (in, out), i.e. already transposed vs nn.Linear.weight.
    k1 = 1.0 / (S ** 0.5)
    w1 = jax.random.uniform(kw1, (S, D), minval=-k1, maxval=k1, dtype=jnp.float32)
    b1 = jax.random.uniform(kb1, (1, D), minval=-k1, maxval=k1, dtype=jnp.float32)
    k2 = 1.0 / (D ** 0.5)
    w2 = jax.random.uniform(kw2, (D, S), minval=-k2, maxval=k2, dtype=jnp.float32)
    b2 = jax.random.uniform(kb2, (1, S), minval=-k2, maxval=k2, dtype=jnp.float32)

    out = channel_wise_attention(x, w1, b1, w2, b2)
    out = jax.block_until_ready(out)

    ref = _reference(x, w1, b1, w2, b2)
    assert out.shape == (B, C, 1, 1)
    # Tolerance covers bf16 MXU operands (f32 accumulation, f32 softmax/pooling);
    # estimated error is ~1e-4 absolute at these shapes.
    assert jnp.allclose(out, ref, atol=2e-3, rtol=2e-3), "mismatch vs JAX reference"

    print("KERNEL_OK")
</pallas_src>

<mosaic_0001>
module attributes {stable_mosaic.version = 11 : i64} {
  func.func @cwa_kernel(%arg0: i32, %arg1: memref<128x256xf32, #tpu.memory_space<vmem>>, %arg2: memref<256x64xbf16, #tpu.memory_space<vmem>>, %arg3: memref<1x64xf32, #tpu.memory_space<vmem>>, %arg4: memref<64x256xbf16, #tpu.memory_space<vmem>>, %arg5: memref<1x256xf32, #tpu.memory_space<vmem>>, %arg6: memref<1x128xf32, #tpu.memory_space<vmem>>) attributes {dimension_semantics = [#tpu.dimension_semantics<parallel>], iteration_bounds = array<i64: 1>, scalar_prefetch = 0 : i64, scratch_operands = 0 : i64, tpu.core_type = #tpu.core_type<tc>, window_params = [{transform_indices = @transform_0, window_bounds = array<i64: 128, 256>}, {pipeline_mode = #tpu.pipeline_mode<synchronous>, transform_indices = @transform_1, window_bounds = array<i64: 256, 64>}, {pipeline_mode = #tpu.pipeline_mode<synchronous>, transform_indices = @transform_2, window_bounds = array<i64: 1, 64>}, {pipeline_mode = #tpu.pipeline_mode<synchronous>, transform_indices = @transform_3, window_bounds = array<i64: 64, 256>}, {pipeline_mode = #tpu.pipeline_mode<synchronous>, transform_indices = @transform_4, window_bounds = array<i64: 1, 256>}, {transform_indices = @transform_5, window_bounds = array<i64: 1, 128>}]} {
    %c0 = arith.constant 0 : index
    %c0_0 = arith.constant 0 : index
    %0 = vector.load %arg1[%c0, %c0_0] : memref<128x256xf32, #tpu.memory_space<vmem>>, vector<128x256xf32>
    %1 = arith.truncf %0 : vector<128x256xf32> to vector<128x256xbf16>
    %c0_1 = arith.constant 0 : index
    %c0_2 = arith.constant 0 : index
    %2 = vector.load %arg2[%c0_1, %c0_2] : memref<256x64xbf16, #tpu.memory_space<vmem>>, vector<256x64xbf16>
    %cst = arith.constant dense<0.000000e+00> : vector<128x64xf32>
    %3 = tpu.matmul %1, %2, %cst {dimension_numbers = #tpu.dot_dimension_numbers<[1], [0], [0], [1], [0, 0, 1, 1], [], []>} : vector<128x256xbf16>, vector<256x64xbf16>, vector<128x64xf32> -> vector<128x64xf32>
    %c0_3 = arith.constant 0 : index
    %c0_4 = arith.constant 0 : index
    %4 = vector.load %arg3[%c0_3, %c0_4] : memref<1x64xf32, #tpu.memory_space<vmem>>, vector<1x64xf32>
    %5 = vector.broadcast %4 : vector<1x64xf32> to vector<128x64xf32>
    %6 = arith.addf %3, %5 : vector<128x64xf32>
    %cst_5 = arith.constant 0.000000e+00 : f32
    %7 = vector.broadcast %cst_5 : f32 to vector<128x64xf32>
    %8 = arith.maximumf %6, %7 : vector<128x64xf32>
    %9 = arith.truncf %8 : vector<128x64xf32> to vector<128x64xbf16>
    %c0_6 = arith.constant 0 : index
    %c0_7 = arith.constant 0 : index
    %10 = vector.load %arg4[%c0_6, %c0_7] : memref<64x256xbf16, #tpu.memory_space<vmem>>, vector<64x256xbf16>
    %cst_8 = arith.constant dense<0.000000e+00> : vector<128x256xf32>
    %11 = tpu.matmul %9, %10, %cst_8 {dimension_numbers = #tpu.dot_dimension_numbers<[1], [0], [0], [1], [0, 0, 1, 1], [], []>} : vector<128x64xbf16>, vector<64x256xbf16>, vector<128x256xf32> -> vector<128x256xf32>
    %c0_9 = arith.constant 0 : index
    %c0_10 = arith.constant 0 : index
    %12 = vector.load %arg5[%c0_9, %c0_10] : memref<1x256xf32, #tpu.memory_space<vmem>>, vector<1x256xf32>
    %13 = vector.broadcast %12 : vector<1x256xf32> to vector<128x256xf32>
    %14 = arith.addf %11, %13 : vector<128x256xf32>
    %cst_11 = arith.constant dense<0xFF800000> : vector<128xf32>
    %15 = vector.multi_reduction <maximumf>, %14, %cst_11 [1] : vector<128x256xf32> to vector<128xf32>
    %16 = vector.shape_cast %15 : vector<128xf32> to vector<128x1xf32>
    %17 = vector.broadcast %16 : vector<128x1xf32> to vector<128x256xf32>
    %18 = arith.subf %14, %17 : vector<128x256xf32>
    %19 = math.exp %18 : vector<128x256xf32>
    %20 = arith.mulf %0, %19 : vector<128x256xf32>
    %cst_12 = arith.constant dense<0.000000e+00> : vector<128xf32>
    %21 = vector.multi_reduction <add>, %20, %cst_12 [1] : vector<128x256xf32> to vector<128xf32>
    %22 = vector.shape_cast %21 : vector<128xf32> to vector<128x1xf32>
    %cst_13 = arith.constant dense<0.000000e+00> : vector<128xf32>
    %23 = vector.multi_reduction <add>, %19, %cst_13 [1] : vector<128x256xf32> to vector<128xf32>
    %24 = vector.shape_cast %23 : vector<128xf32> to vector<128x1xf32>
    %25 = arith.divf %22, %24 : vector<128x1xf32>
    %26 = tpu.iota {dimensions = array<i32: 0>} : vector<128x128xi32>
    %27 = tpu.iota {dimensions = array<i32: 1>} : vector<128x128xi32>
    %28 = arith.cmpi eq, %26, %27 : vector<128x128xi32>
    %cst_14 = arith.constant 0.000000e+00 : f32
    %29 = vector.shape_cast %25 : vector<128x1xf32> to vector<128x1xf32>
    %30 = vector.broadcast %29 : vector<128x1xf32> to vector<128x128xf32>
    %31 = vector.broadcast %cst_14 : f32 to vector<128x128xf32>
    %32 = arith.select %28, %30, %31 : vector<128x128xi1>, vector<128x128xf32>
    %cst_15 = arith.constant dense<0.000000e+00> : vector<128xf32>
    %33 = vector.multi_reduction <add>, %32, %cst_15 [0] : vector<128x128xf32> to vector<128xf32>
    %34 = vector.shape_cast %33 : vector<128xf32> to vector<1x128xf32>
    %c0_16 = arith.constant 0 : index
    %c0_17 = arith.constant 0 : index
    %35 = vector.load %arg6[%c0_16, %c0_17] : memref<1x128xf32, #tpu.memory_space<vmem>>, vector<1x128xf32>
    tpu.vector_store %arg6[%c0_16, %c0_17], %34 {strides = array<i32>} : memref<1x128xf32, #tpu.memory_space<vmem>>, vector<1x128xf32>,
    return
  }
  func.func @transform_0(%arg0: i32) -> (i32, i32) {
    %c0_i32 = arith.constant 0 : i32
    %c0_i32_0 = arith.constant 0 : i32
    return %arg0, %c0_i32 : i32, i32
  }
  func.func @transform_1(%arg0: i32) -> (i32, i32) {
    %c0_i32 = arith.constant 0 : i32
    %c0_i32_0 = arith.constant 0 : i32
    %c0_i32_1 = arith.constant 0 : i32
    return %c0_i32, %c0_i32_0 : i32, i32
  }
  func.func @transform_2(%arg0: i32) -> (i32, i32) {
    %c0_i32 = arith.constant 0 : i32
    %c0_i32_0 = arith.constant 0 : i32
    %c0_i32_1 = arith.constant 0 : i32
    return %c0_i32, %c0_i32_0 : i32, i32
  }
  func.func @transform_3(%arg0: i32) -> (i32, i32) {
    %c0_i32 = arith.constant 0 : i32
    %c0_i32_0 = arith.constant 0 : i32
    %c0_i32_1 = arith.constant 0 : i32
    return %c0_i32, %c0_i32_0 : i32, i32
  }
  func.func @transform_4(%arg0: i32) -> (i32, i32) {
    %c0_i32 = arith.constant 0 : i32
    %c0_i32_0 = arith.constant 0 : i32
    %c0_i32_1 = arith.constant 0 : i32
    return %c0_i32, %c0_i32_0 : i32, i32
  }
  func.func @transform_5(%arg0: i32) -> (i32, i32) {
    %c0_i32 = arith.constant 0 : i32
    %c0_i32_0 = arith.constant 0 : i32
    return %c0_i32, %arg0 : i32, i32
  }
}

</mosaic_0001>

<bundles_post_ra>
// kernel: tpu_custom_call.1
= control target key start
LH: loop header
LB: loop body
LE: loop exit
PB: predicated region body
PF: predicated region fallthrough
CT: control target
= control target key end

     0   :  { %10 = vsyncpa [#allocation3], 0  ;;  %s1685_s0 = inlined_call_operand.hbm [shape: f32[128,256], index: 0, kind: input, shape index: {}]   ;;  %s1686_s1 = inlined_call_operand.vmem [shape: bf16[256,64], index: 1, kind: input, shape index: {}]   ;;  %s1687_s2 = inlined_call_operand.vmem [shape: f32[1,64], index: 2, kind: input, shape index: {}]   ;;  %s1688_s3 = inlined_call_operand.vmem [shape: bf16[64,256], index: 3, kind: input, shape index: {}]   ;;  %s1689_s4 = inlined_call_operand.vmem [shape: f32[1,256], index: 4, kind: input, shape index: {}]   ;;  %s1690_s5 = inlined_call_operand.hbm [shape: f32[1,128], index: 5, kind: output, shape index: {}]  }
   0x1   :  { %11 = vsyncpa [#allocation4], 0  ;;  %s1200_s18 = smov [#allocation2]  }
   0x2   :  { %s17_s19 = sshll.u32 %s1200_s18, 4  ;;  %s18_s19 = int_to_ptr.vmem [resolvable:$true] %s17_s19 }
   0x3   :  { %s1164_s20 = scalar_lea.vmem %s18_s19, 4096  ;;  %p1169_p1 = scmp.lt.s32.totalorder %s18_s19, %s18_s19 }
   0x4   :  { %p1165_p0 = scmp.ne.s32.totalorder %s18_s19, %s1164_s20  ;;  %p1170_p2 = scmp.lt.s32.totalorder %s1164_s20, %s1164_s20 }
   0x6   :  { %p1171_p3 = por %p1170_p2, %p1169_p1 }
   0x8   :  { %p1172_p4 = pnand %p1171_p3, %p1165_p0 }
   0xa   :  { %1175 = shalt.err (!%p1172_p4)
}
   0xb   :  { %s1201_s21 = smov 256   ;;  %s1202_s22 = smov 16  }
   0xc   :  { %23 = dma.hbm_to_vmem [thread:$0]  %s1685_s0, 4096, %s18_s19, [#allocation3], %s1201_s21, %s1201_s21, %s1202_s22  }
   0xd   :  { %1196 = dma.done.wait [#allocation3], 4096  }
   0xe   :  { %1197 = vsyncadd [#allocation3], 4294963200  ;;  %v1032_v0 = vld [vmem:[%s1686_s1 + $0x78] sm:$0xff]   ;;  %v1034_v2 = vld [vmem:[%s1686_s1 + $0x70] sm:$0xff]   ;;  %vm400_vm0 = vcmask 523264  }
   0xf   :  { %v1033_v1 = vld [vmem:[%s1686_s1 + $0x38] sm:$0xff]   ;;  %963 = vmatprep.subr.bf16.mxu0 %v1032_v0  ;;  %v1035_v3 = vld [vmem:[%s1686_s1 + $0x30] sm:$0xff]   ;;  %v1036_v4 = vld [vmem:[%s1686_s1 + $0x68] sm:$0xff]  }
  0x10   :  { %964 = vmatpush3.bf16.msra.mxu0 %v1033_v1  ;;  %v1037_v5 = vld [vmem:[%s1686_s1 + $0x28] sm:$0xff]   ;;  %v1038_v6 = vld [vmem:[%s1686_s1 + $0x60] sm:$0xff]   ;;  %v1040_v8 = vld [vmem:[%s1686_s1 + $0x58] sm:$0xff]  }
  0x11   :  { %965 = vmatprep.subr.bf16.mxu0 %v1034_v2  ;;  %v1039_v7 = vld [vmem:[%s1686_s1 + $0x20] sm:$0xff]   ;;  %v1041_v9 = vld [vmem:[%s1686_s1 + $0x18] sm:$0xff]   ;;  %v1042_v10 = vld [vmem:[%s1686_s1 + $0x50] sm:$0xff]  }
  0x12   :  { %v1271_v11 = vld [vmem:[#allocation2 + $0x8] sm:$0xff]  ;;  %v1273_v12 = vld [vmem:[#allocation2 + $0x18] sm:$0xff]  ;;  %v1043_v14 = vld [vmem:[%s1686_s1 + $0x10] sm:$0xff]  }
  0x13   :  { %v69_v13 = vpack.c.bf16 %v1273_v12, %v1271_v11  ;;  %v1044_v15 = vld [vmem:[%s1686_s1 + $0x48] sm:$0xff]   ;;  %v1046_v17 = vld [vmem:[%s1686_s1 + $0x40] sm:$0xff]   ;;  %v1294_v20 = vld [vmem:[#allocation2 + $0x10] sm:$0xff] }
  0x14   :  { %966 = vmatpush3.bf16.msra.mxu0 %v1035_v3  ;;  %v1045_v16 = vld [vmem:[%s1686_s1 + $0x8] sm:$0xff]   ;;  %v1047_v18 = vld [vmem:[%s1686_s1] sm:$0xff]   ;;  %v1298_v22 = vld [vmem:[#allocation2 + $0x38] sm:$0xff] }
  0x15   :  { %967 = vmatprep.subr.bf16.mxu0 %v1036_v4  ;;  %251 = vmatprep.mubr.bf16.mxu0 %v69_v13  ;;  %v1292_v19 = vld [vmem:[#allocation2] sm:$0xff]  ;;  %v1296_v21 = vld [vmem:[#allocation2 + $0x28] sm:$0xff]  ;;  %v1048_v23 = vld [vmem:[%s1688_s3 + $0x34] ss:$8 sps:$4 sm:$0xff]  }
  0x16   :  { %433 = vmatprep.subr.bf16.mxu1 %v1048_v23  ;;  %v68_v24 = vpack.c.bf16 %v1294_v20, %v1292_v19  ;;  %v71_v25 = vpack.c.bf16 %v1298_v22, %v1296_v21  ;;  %v1307_v26 = vld [vmem:[#allocation2 + $0x20] sm:$0xff]  ;;  %v1309_v27 = vld [vmem:[#allocation2 + $0x30] sm:$0xff]  ;;  %v1311_v28 = vld [vmem:[#allocation2 + $0x48] sm:$0xff] }
  0x17   :  { %v1313_v29 = vld [vmem:[#allocation2 + $0x58] sm:$0xff]  ;;  %v70_v30 = vpack.c.bf16 %v1309_v27, %v1307_v26  ;;  %v1319_v32 = vld [vmem:[#allocation2 + $0x40] sm:$0xff]  ;;  %v1321_v33 = vld [vmem:[#allocation2 + $0x50] sm:$0xff] }
  0x18   :  { %968 = vmatpush3.bf16.msra.mxu0 %v1037_v5  ;;  %v73_v31 = vpack.c.bf16 %v1313_v29, %v1311_v28  ;;  %v1323_v34 = vld [vmem:[#allocation2 + $0x68] sm:$0xff]  ;;  %v1325_v35 = vld [vmem:[#allocation2 + $0x78] sm:$0xff]  ;;  %v72_v36 = vpack.c.bf16 %v1321_v33, %v1319_v32  ;;  %v1331_v38 = vld [vmem:[#allocation2 + $0x60] sm:$0xff] }
  0x19   :  { %969 = vmatprep.subr.bf16.mxu0 %v1038_v6  ;;  %v75_v37 = vpack.c.bf16 %v1325_v35, %v1323_v34  ;;  %v1333_v39 = vld [vmem:[#allocation2 + $0x70] sm:$0xff]  ;;  %v1335_v40 = vld [vmem:[#allocation2 + $0x88] sm:$0xff]  ;;  %v1337_v41 = vld [vmem:[#allocation2 + $0x98] sm:$0xff] }
  0x1a   :  { %1707 = vst [vmem:[#allocation8_spill] sm:$0xff] %v1337_v41  ;;  %v74_v42 = vpack.c.bf16 %v1333_v39, %v1331_v38  ;;  %v77_v43 = vpack.c.bf16 %v1337_v41, %v1335_v40  ;;  %v1343_v44 = vld [vmem:[#allocation2 + $0x80] sm:$0xff]  ;;  %v1345_v45 = vld [vmem:[#allocation2 + $0x90] sm:$0xff]  ;;  %v1347_v46 = vld [vmem:[#allocation2 + $0xa8] sm:$0xff] }
  0x1b   :  { %1708 = vst [vmem:[#allocation9_spill] sm:$0xff] %v1347_v46  ;;  %v1349_v47 = vld [vmem:[#allocation2 + $0xb8] sm:$0xff]  ;;  %v76_v48 = vpack.c.bf16 %v1345_v45, %v1343_v44  ;;  %v1355_v50 = vld [vmem:[#allocation2 + $0xa0] sm:$0xff]  ;;  %v1357_v51 = vld [vmem:[#allocation2 + $0xb0] sm:$0xff] }
  0x1c   :  { %970 = vmatpush3.bf16.msra.mxu0 %v1039_v7  ;;  %1709 = vst [vmem:[#allocation10_spill] sm:$0xff] %v1349_v47  ;;  %v79_v49 = vpack.c.bf16 %v1349_v47, %v1347_v46  ;;  %1710 = vst [vmem:[#allocation11_spill] sm:$0xff] %v1355_v50  ;;  %v1359_v52 = vld [vmem:[#allocation2 + $0xc8] sm:$0xff]  ;;  %v1361_v53 = vld [vmem:[#allocation2 + $0xd8] sm:$0xff]  ;;  %v78_v54 = vpack.c.bf16 %v1357_v51, %v1355_v50 }
  0x1d   :  { %971 = vmatprep.subr.bf16.mxu0 %v1040_v8  ;;  %1711 = vst [vmem:[#allocation12_spill] sm:$0xff] %v1357_v51  ;;  %1712 = vst [vmem:[#allocation13_spill] sm:$0xff] %v1359_v52  ;;  %v81_v55 = vpack.c.bf16 %v1361_v53, %v1359_v52  ;;  %v1367_v56 = vld [vmem:[#allocation2 + $0xc0] sm:$0xff]  ;;  %v1369_v57 = vld [vmem:[#allocation2 + $0xd0] sm:$0xff]  ;;  %v1203_v8 = vmov 0  }
  0x1e   :  { %1713 = vst [vmem:[#allocation14_spill] sm:$0xff] %v1361_v53  ;;  %1714 = vst [vmem:[#allocation15_spill] sm:$0xff] %v1367_v56  ;;  %v1371_v58 = vld [vmem:[#allocation2 + $0xe8] sm:$0xff]  ;;  %v1373_v59 = vld [vmem:[#allocation2 + $0xf8] sm:$0xff]  ;;  %v80_v60 = vpack.c.bf16 %v1369_v57, %v1367_v56  ;;  %457 = vmatprep.mubr.bf16.mxu1 %v1203_v8 }
  0x1f   :  { %1715 = vst [vmem:[#allocation16_spill] sm:$0xff] %v1369_v57  ;;  %1716 = vst [vmem:[#allocation17_spill] sm:$0xff] %v1371_v58  ;;  %v83_v61 = vpack.c.bf16 %v1373_v59, %v1371_v58  ;;  %v1379_v62 = vld [vmem:[#allocation2 + $0xe0] sm:$0xff]  ;;  %v1381_v63 = vld [vmem:[#allocation2 + $0xf0] sm:$0xff] }
  0x20   :  { %972 = vmatpush3.bf16.msra.mxu0 %v1041_v9  ;;  %1717 = vst [vmem:[#allocation18_spill] sm:$0xff] %v1373_v59  ;;  %1718 = vst [vmem:[#allocation19_spill] sm:$0xff] %v1379_v62  ;;  %v82_v0 = vpack.c.bf16 %v1381_v63, %v1379_v62  ;;  %v1050_v1 = vld [vmem:[%s1688_s3 + $0x30] ss:$8 sps:$4 sm:$0xff]   ;;  %v1051_v2 = vld [vmem:[%s1688_s3 + $0x24] ss:$8 sps:$4 sm:$0xff]  }
  0x21   :  { %973 = vmatprep.subr.bf16.mxu0 %v1042_v10  ;;  %1719 = vst [vmem:[#allocation20_spill] sm:$0xff] %v1381_v63  ;;  %434 = vmatpush1.bf16.msra.mxu1 %v1050_v1  ;;  %v1053_v3 = vld [vmem:[%s1688_s3 + $0x20] ss:$8 sps:$4 sm:$0xff]   ;;  %v1054_v4 = vld [vmem:[%s1688_s3 + $0x14] ss:$8 sps:$4 sm:$0xff]  }
  0x22   :  { %435 = vmatprep.subr.bf16.mxu1 %v1051_v2  ;;  %v1056_v5 = vld [vmem:[%s1688_s3 + $0x10] ss:$8 sps:$4 sm:$0xff]   ;;  %v1057_v6 = vld [vmem:[%s1688_s3 + $0x4] ss:$8 sps:$4 sm:$0xff]   ;;  %v1059_v7 = vld [vmem:[%s1688_s3] ss:$8 sps:$4 sm:$0xff]  }
  0x24   :  { %974 = vmatpush3.bf16.msra.mxu0 %v1043_v14  ;;  %v1410_v14 = vld [vmem:[%s1687_s2] ss:$0 sm:$0xff] }
  0x25   :  { %975 = vmatprep.subr.bf16.mxu0 %v1044_v15  ;;  %436 = vmatpush1.bf16.msra.mxu1 %v1053_v3 }
  0x26   :  { %437 = vmatprep.subr.bf16.mxu1 %v1054_v4 }
  0x28   :  { %976 = vmatpush3.bf16.msra.mxu0 %v1045_v16 }
  0x29   :  { %977 = vmatprep.subr.bf16.mxu0 %v1046_v17  ;;  %438 = vmatpush1.bf16.msra.mxu1 %v1056_v5 }
  0x2a   :  { %439 = vmatprep.subr.bf16.mxu1 %v1057_v6 }
  0x2c   :  { %978 = vmatpush3.bf16.msra.mxu0 %v1047_v18 }
  0x2d   :  { %440 = vmatpush1.bf16.msra.mxu1 %v1059_v7 }
  0x2f   :  { %252 = vmatmul.mubr.bf16.vlgmr.msra.gmra.mxu0 %v68_v24 }
  0x30   :  { %259 = vmatprep.mubr.bf16.mxu0 %v71_v25 }
  0x37   :  { %260 = vmatmul.mubr.bf16.gmra.mxu0 %v70_v30 }
  0x38   :  { %267 = vmatprep.mubr.bf16.mxu0 %v73_v31 }
  0x3f   :  { %268 = vmatmul.mubr.bf16.gmra.mxu0 %v72_v36 }
  0x40   :  { %275 = vmatprep.mubr.bf16.mxu0 %v75_v37 }
  0x47   :  { %276 = vmatmul.mubr.bf16.gmra.mxu0 %v74_v42 }
  0x48   :  { %283 = vmatprep.mubr.bf16.mxu0 %v77_v43 }
  0x4f   :  { %284 = vmatmul.mubr.bf16.gmra.mxu0 %v76_v48 }
  0x50   :  { %291 = vmatprep.mubr.bf16.mxu0 %v79_v49 }
  0x57   :  { %292 = vmatmul.mubr.bf16.gmra.mxu0 %v78_v54 }
  0x58   :  { %299 = vmatprep.mubr.bf16.mxu0 %v81_v55 }
  0x5f   :  { %300 = vmatmul.mubr.bf16.gmra.mxu0 %v80_v60 }
  0x60   :  { %307 = vmatprep.mubr.bf16.mxu0 %v83_v61 }
  0x67   :  { %308 = vmatmul.mubr.bf16.gmra.mxu0 %v82_v0 }
  0xef   :  { %v979_v9 = vpop.f32.mrf.mxu0 }
  0xf1   :  { %v980_v10 = vpop.f32.mrf.mxu0 }
  0xf2   :  { %v981_v13 = vadd.f32 %v980_v10, %v979_v9 }
  0xf3   :  { %v982_v15 = vpop.f32.mrf.mxu0 }
  0xf4   :  { %v254_v17 = vadd.f32 %v981_v13, %v1410_v14 }
  0xf5   :  { %v983_v16 = vpop.f32.mrf.mxu0 }
  0xf6   :  { %v984_v18 = vadd.f32 %v983_v16, %v982_v15  ;;  %v316_v30 = vmax.f32 %v254_v17, 0.0 }
  0xf7   :  { %v985_v23 = vpop.f32.mrf.mxu0 }
  0xf8   :  { %v257_v24 = vadd.f32 %v984_v18, %v1410_v14 }
  0xf9   :  { %v986_v25 = vpop.f32.mrf.mxu0 }
  0xfa   :  { %v317_v31 = vmax.f32 %v257_v24, 0.0  ;;  %v987_v36 = vadd.f32 %v986_v25, %v985_v23 }
  0xfb   :  { %v988_v37 = vpop.f32.mrf.mxu0 }
  0xfc   :  { %v332_v42 = vpack.c.bf16 %v317_v31, %v316_v30  ;;  %v262_v48 = vadd.f32 %v987_v36, %v1410_v14 }
  0xfd   :  { %v989_v43 = vpop.f32.mrf.mxu0 }
  0xfe   :  { %v990_v49 = vadd.f32 %v989_v43, %v988_v37  ;;  %955 = vmatmul.mubr.msk.bf16.vlgmr.msra.gmra.mxu1 %vm400_vm0, %v332_v42  ;;  %v318_v61 = vmax.f32 %v262_v48, 0.0 }
  0xff   :  { %v991_v54 = vpop.f32.mrf.mxu0  ;;  %467 = vmatprep.mubr.bf16.mxu1 %v1203_v8 }
 0x100   :  { %v265_v55 = vadd.f32 %v990_v49, %v1410_v14 }
 0x101   :  { %v992_v60 = vpop.f32.mrf.mxu0 }
 0x102   :  { %v319_v0 = vmax.f32 %v265_v55, 0.0  ;;  %v993_v1 = vadd.f32 %v992_v60, %v991_v54 }
 0x103   :  { %v994_v2 = vpop.f32.mrf.mxu0 }
 0x104   :  { %v333_v3 = vpack.c.bf16 %v319_v0, %v318_v61  ;;  %v270_v5 = vadd.f32 %v993_v1, %v1410_v14 }
 0x105   :  { %v995_v4 = vpop.f32.mrf.mxu0 }
 0x106   :  { %v996_v6 = vadd.f32 %v995_v4, %v994_v2  ;;  %956 = vmatmul.mubr.msk.bf16.gmra.mxu1 %vm400_vm0, %v333_v3  ;;  %v320_v13 = vmax.f32 %v270_v5, 0.0 }
 0x107   :  { %v997_v7 = vpop.f32.mrf.mxu0  ;;  %477 = vmatprep.mubr.bf16.mxu1 %v1203_v8 }
 0x108   :  { %v273_v9 = vadd.f32 %v996_v6, %v1410_v14 }
 0x109   :  { %v998_v10 = vpop.f32.mrf.mxu0 }
 0x10a   :  { %v321_v15 = vmax.f32 %v273_v9, 0.0  ;;  %v999_v16 = vadd.f32 %v998_v10, %v997_v7 }
 0x10b   :  { %v1000_v17 = vpop.f32.mrf.mxu0 }
 0x10c   :  { %v334_v18 = vpack.c.bf16 %v321_v15, %v320_v13  ;;  %v278_v24 = vadd.f32 %v999_v16, %v1410_v14 }
 0x10d   :  { %v1001_v23 = vpop.f32.mrf.mxu0 }
 0x10e   :  { %v1002_v25 = vadd.f32 %v1001_v23, %v1000_v17  ;;  %957 = vmatmul.mubr.msk.bf16.gmra.mxu1 %vm400_vm0, %v334_v18  ;;  %v322_v37 = vmax.f32 %v278_v24, 0.0 }
 0x10f   :  { %v1003_v30 = vpop.f32.mrf.mxu0  ;;  %487 = vmatprep.mubr.bf16.mxu1 %v1203_v8 }
 0x110   :  { %v281_v31 = vadd.f32 %v1002_v25, %v1410_v14 }
 0x111   :  { %v1004_v36 = vpop.f32.mrf.mxu0 }
 0x112   :  { %v323_v42 = vmax.f32 %v281_v31, 0.0  ;;  %v1005_v43 = vadd.f32 %v1004_v36, %v1003_v30 }
 0x113   :  { %v1006_v48 = vpop.f32.mrf.mxu0 }
 0x114   :  { %v335_v49 = vpack.c.bf16 %v323_v42, %v322_v37  ;;  %v286_v55 = vadd.f32 %v1005_v43, %v1410_v14 }
 0x115   :  { %v1007_v54 = vpop.f32.mrf.mxu0 }
 0x116   :  { %v1008_v60 = vadd.f32 %v1007_v54, %v1006_v48  ;;  %958 = vmatmul.mubr.msk.bf16.gmra.mxu1 %vm400_vm0, %v335_v49  ;;  %v324_v2 = vmax.f32 %v286_v55, 0.0 }
 0x117   :  { %v1009_v61 = vpop.f32.mrf.mxu0  ;;  %497 = vmatprep.mubr.bf16.mxu1 %v1203_v8 }
 0x118   :  { %v289_v0 = vadd.f32 %v1008_v60, %v1410_v14 }
 0x119   :  { %v1010_v1 = vpop.f32.mrf.mxu0 }
 0x11a   :  { %v325_v3 = vmax.f32 %v289_v0, 0.0  ;;  %v1011_v4 = vadd.f32 %v1010_v1, %v1009_v61 }
 0x11b   :  { %v1012_v5 = vpop.f32.mrf.mxu0 }
 0x11c   :  { %v336_v6 = vpack.c.bf16 %v325_v3, %v324_v2  ;;  %v294_v9 = vadd.f32 %v1011_v4, %v1410_v14 }
 0x11d   :  { %v1013_v7 = vpop.f32.mrf.mxu0 }
 0x11e   :  { %v1014_v10 = vadd.f32 %v1013_v7, %v1012_v5  ;;  %959 = vmatmul.mubr.msk.bf16.gmra.mxu1 %vm400_vm0, %v336_v6  ;;  %v326_v17 = vmax.f32 %v294_v9, 0.0  ;;  %v1691_v6 = vlaneseq }
 0x11f   :  { %v1015_v13 = vpop.f32.mrf.mxu0  ;;  %507 = vmatprep.mubr.bf16.mxu1 %v1203_v8 }
 0x120   :  { %v297_v15 = vadd.f32 %v1014_v10, %v1410_v14  ;;  %v1444_v7 = vshrl.u32 %v1691_v6, 7 }
 0x121   :  { %v1016_v16 = vpop.f32.mrf.mxu0 }
 0x122   :  { %v327_v18 = vmax.f32 %v297_v15, 0.0  ;;  %v1017_v23 = vadd.f32 %v1016_v16, %v1015_v13  ;;  %1720 = vst [vmem:[#allocation21_spill] sm:$0xff] %v1444_v7  ;;  %v352_v9 = vsub.s32 0, %v1444_v7  ;;  %v356_v10 = vsub.s32 1, %v1444_v7  ;;  %v348_v13 = vld [vmem:[%s1689_s4] sm:$0x3] }
 0x123   :  { %v1018_v24 = vpop.f32.mrf.mxu0  ;;  %s1204_s4 = smov [#allocation5]  }
 0x124   :  { %v337_v25 = vpack.c.bf16 %v327_v18, %v326_v17  ;;  %v302_v31 = vadd.f32 %v1017_v23, %v1410_v14  ;;  %s921_s22 = sshll.u32 %s1204_s4, 4  ;;  %s922_s22 = int_to_ptr.vmem [resolvable:$true] %s921_s22 }
 0x125   :  { %v1019_v30 = vpop.f32.mrf.mxu0  ;;  %s1176_s23 = scalar_lea.vmem %s922_s22, 16  ;;  %s1180_s24 = scalar_lea.vmem %s922_s22, 32 }
 0x126   :  { %v1020_v36 = vadd.f32 %v1019_v30, %v1018_v24  ;;  %960 = vmatmul.mubr.msk.bf16.gmra.mxu1 %vm400_vm0, %v337_v25  ;;  %v328_v48 = vmax.f32 %v302_v31, 0.0  ;;  %p1177_p5 = scmp.ne.s32.totalorder %s922_s22, %s1176_s23  ;;  %p1181_p6 = scmp.lt.s32.totalorder %s922_s22, %s922_s22 }
 0x127   :  { %v1021_v37 = vpop.f32.mrf.mxu0  ;;  %517 = vmatprep.mubr.bf16.mxu1 %v1203_v8  ;;  %p1182_p7 = scmp.lt.s32.totalorder %s1180_s24, %s1176_s23 }
 0x128   :  { %v305_v42 = vadd.f32 %v1020_v36, %v1410_v14 }
 0x129   :  { %v1022_v43 = vpop.f32.mrf.mxu0  ;;  %p1183_p8 = por %p1182_p7, %p1181_p6 }
 0x12a   :  { %v329_v49 = vmax.f32 %v305_v42, 0.0  ;;  %v1023_v54 = vadd.f32 %v1022_v43, %v1021_v37 }
 0x12b   :  { %v1024_v55 = vpop.f32.mrf.mxu0  ;;  %p1184_p9 = pnand %p1183_p8, %p1177_p5 }
 0x12c   :  { %v338_v60 = vpack.c.bf16 %v329_v49, %v328_v48  ;;  %v310_v0 = vadd.f32 %v1023_v54, %v1410_v14 }
 0x12d   :  { %v1025_v61 = vpop.f32.mrf.mxu0 }
 0x12e   :  { %v1026_v1 = vadd.f32 %v1025_v61, %v1024_v55  ;;  %961 = vmatmul.mubr.msk.bf16.gmra.mxu1 %vm400_vm0, %v338_v60  ;;  %v330_v3 = vmax.f32 %v310_v0, 0.0 }
 0x12f   :  { %527 = vmatprep.mubr.bf16.mxu1 %v1203_v8  ;;  %v1451_v8 = vrot.slane %v348_v13, %v352_v9 }
 0x130   :  { %v313_v2 = vadd.f32 %v1026_v1, %v1410_v14  ;;  %v1453_v14 = vrot.slane %v348_v13, %v356_v10 }
 0x132   :  { %v331_v4 = vmax.f32 %v313_v2, 0.0 }
 0x134   :  { %v339_v5 = vpack.c.bf16 %v331_v4, %v330_v3 }
 0x136   :  { %962 = vmatmul.mubr.msk.bf16.gmra.mxu1 %vm400_vm0, %v339_v5 }
 0x1be   :  { %v459_v15 = vpop.f32.mrf.mxu1 }
 0x1bf   :  { %v1456_v17 = vadd.f32 %v459_v15, %v1451_v8 }
 0x1c0   :  { %v461_v16 = vpop.f32.mrf.mxu1 }
 0x1c1   :  { %v1459_v18 = vadd.f32 %v461_v16, %v1453_v14 }
 0x1c2   :  { %v463_v23 = vpop.f32.mrf.mxu1 }
 0x1c3   :  { %v538_v24 = vmax.f32 %v1456_v17, %v1459_v18  ;;  %v1464_v30 = vadd.f32 %v463_v23, %v1451_v8 }
 0x1c4   :  { %v465_v25 = vpop.f32.mrf.mxu1 }
 0x1c5   :  { %v1467_v31 = vadd.f32 %v465_v25, %v1453_v14  ;;  %539 = vmax.xlane.f32.xlu0 %v538_v24 }
 0x1c6   :  { %v469_v36 = vpop.f32.mrf.mxu1 }
 0x1c7   :  { %v541_v37 = vmax.f32 %v1464_v30, %v1467_v31  ;;  %v1472_v43 = vadd.f32 %v469_v36, %v1451_v8 }
 0x1c8   :  { %v471_v42 = vpop.f32.mrf.mxu1 }
 0x1c9   :  { %v1475_v48 = vadd.f32 %v471_v42, %v1453_v14  ;;  %542 = vmax.xlane.f32.xlu0 %v541_v37 }
 0x1ca   :  { %v473_v49 = vpop.f32.mrf.mxu1 }
 0x1cb   :  { %v544_v54 = vmax.f32 %v1472_v43, %v1475_v48  ;;  %v1480_v60 = vadd.f32 %v473_v49, %v1451_v8 }
 0x1cc   :  { %v475_v55 = vpop.f32.mrf.mxu1 }
 0x1cd   :  { %v1483_v61 = vadd.f32 %v475_v55, %v1453_v14  ;;  %545 = vmax.xlane.f32.xlu1 %v544_v54 }
 0x1ce   :  { %v479_v0 = vpop.f32.mrf.mxu1 }
 0x1cf   :  { %v547_v1 = vmax.f32 %v1480_v60, %v1483_v61  ;;  %v1488_v3 = vadd.f32 %v479_v0, %v1451_v8 }
 0x1d0   :  { %v481_v2 = vpop.f32.mrf.mxu1 }
 0x1d1   :  { %v1491_v4 = vadd.f32 %v481_v2, %v1453_v14  ;;  %548 = vmax.xlane.f32.xlu1 %v547_v1 }
 0x1d2   :  { %v483_v5 = vpop.f32.mrf.mxu1 }
 0x1d3   :  { %v550_v9 = vmax.f32 %v1488_v3, %v1491_v4  ;;  %v1496_v13 = vadd.f32 %v483_v5, %v1451_v8 }
 0x1d4   :  { %v485_v10 = vpop.f32.mrf.mxu1 }
 0x1d5   :  { %v1499_v15 = vadd.f32 %v485_v10, %v1453_v14  ;;  %551 = vmax.xlane.f32.xlu0 %v550_v9 }
 0x1d6   :  { %v489_v16 = vpop.f32.mrf.mxu1 }
 0x1d7   :  { %v553_v23 = vmax.f32 %v1496_v13, %v1499_v15  ;;  %v1504_v25 = vadd.f32 %v489_v16, %v1451_v8 }
 0x1d8   :  { %v491_v24 = vpop.f32.mrf.mxu1 }
 0x1d9   :  { %v1507_v36 = vadd.f32 %v491_v24, %v1453_v14  ;;  %554 = vmax.xlane.f32.xlu1 %v553_v23 }
 0x1da   :  { %v493_v37 = vpop.f32.mrf.mxu1 }
 0x1db   :  { %v556_v42 = vmax.f32 %v1504_v25, %v1507_v36  ;;  %v1512_v54 = vadd.f32 %v493_v37, %v1451_v8 }
 0x1dc   :  { %v495_v49 = vpop.f32.mrf.mxu1 }
 0x1dd   :  { %v1515_v55 = vadd.f32 %v495_v49, %v1453_v14  ;;  %557 = vmax.xlane.f32.xlu0 %v556_v42 }
 0x1de   :  { %v499_v0 = vpop.f32.mrf.mxu1 }
 0x1df   :  { %v559_v1 = vmax.f32 %v1512_v54, %v1515_v55  ;;  %v1520_v5 = vadd.f32 %v499_v0, %v1451_v8 }
 0x1e0   :  { %v501_v2 = vpop.f32.mrf.mxu1 }
 0x1e1   :  { %v1523_v9 = vadd.f32 %v501_v2, %v1453_v14  ;;  %560 = vmax.xlane.f32.xlu1 %v559_v1 }
 0x1e2   :  { %v503_v10 = vpop.f32.mrf.mxu1 }
 0x1e3   :  { %v562_v16 = vmax.f32 %v1520_v5, %v1523_v9  ;;  %v1528_v24 = vadd.f32 %v503_v10, %v1451_v8 }
 0x1e4   :  { %v505_v23 = vpop.f32.mrf.mxu1 }
 0x1e5   :  { %v1531_v37 = vadd.f32 %v505_v23, %v1453_v14  ;;  %563 = vmax.xlane.f32.xlu0 %v562_v16 }
 0x1e6   :  { %v509_v42 = vpop.f32.mrf.mxu1 }
 0x1e7   :  { %v565_v49 = vmax.f32 %v1528_v24, %v1531_v37  ;;  %v1536_v2 = vadd.f32 %v509_v42, %v1451_v8 }
 0x1e8   :  { %v511_v0 = vpop.f32.mrf.mxu1 }
 0x1e9   :  { %v1539_v1 = vadd.f32 %v511_v0, %v1453_v14  ;;  %566 = vmax.xlane.f32.xlu1 %v565_v49 }
 0x1ea   :  { %v513_v6 = vpop.f32.mrf.mxu1 }
 0x1eb   :  { %v568_v10 = vmax.f32 %v1536_v2, %v1539_v1  ;;  %v1544_v23 = vadd.f32 %v513_v6, %v1451_v8 }
 0x1ec   :  { %v515_v7 = vpop.f32.mrf.mxu1 }
 0x1ed   :  { %v1547_v16 = vadd.f32 %v515_v7, %v1453_v14  ;;  %569 = vmax.xlane.f32.xlu0 %v568_v10 }
 0x1ee   :  { %v519_v58 = vpop.f32.mrf.mxu1 }
 0x1ef   :  { %v571_v42 = vmax.f32 %v1544_v23, %v1547_v16  ;;  %v1552_v0 = vadd.f32 %v519_v58, %v1451_v8 }
 0x1f0   :  { %v521_v62 = vpop.f32.mrf.mxu1 }
 0x1f1   :  { %v1555_v49 = vadd.f32 %v521_v62, %v1453_v14  ;;  %572 = vmax.xlane.f32.xlu1 %v571_v42 }
 0x1f2   :  { %v523_v52 = vpop.f32.mrf.mxu1 }
 0x1f3   :  { %v574_v6 = vmax.f32 %v1552_v0, %v1555_v49  ;;  %v1560_v7 = vadd.f32 %v523_v52, %v1451_v8 }
 0x1f4   :  { %v525_v56 = vpop.f32.mrf.mxu1 }
 0x1f5   :  { %v1563_v10 = vadd.f32 %v525_v56, %v1453_v14  ;;  %575 = vmax.xlane.f32.xlu0 %v574_v6 }
 0x1f6   :  { %v529_v59 = vpop.f32.mrf.mxu1 }
 0x1f7   :  { %v577_v58 = vmax.f32 %v1560_v7, %v1563_v10  ;;  %v1568_v62 = vadd.f32 %v529_v59, %v1451_v8 }
 0x1f8   :  { %v531_v63 = vpop.f32.mrf.mxu1 }
 0x1f9   :  { %v1571_v42 = vadd.f32 %v531_v63, %v1453_v14  ;;  %578 = vmax.xlane.f32.xlu1 %v577_v58 }
 0x1fa   :  { %v533_v46 = vpop.f32.mrf.mxu1 }
 0x1fb   :  { %v580_v52 = vmax.f32 %v1568_v62, %v1571_v42  ;;  %v1576_v56 = vadd.f32 %v533_v46, %v1451_v8 }
 0x1fc   :  { %v535_v50 = vpop.f32.mrf.mxu1 }
 0x1fd   :  { %v1579_v6 = vadd.f32 %v535_v50, %v1453_v14  ;;  %581 = vmax.xlane.f32.xlu0 %v580_v52 }
 0x1ff   :  { %v583_v59 = vmax.f32 %v1576_v56, %v1579_v6 }
 0x201   :  { %584 = vmax.xlane.f32.xlu1 %v583_v59 }
 0x24e   :  { %v540_v53 = vpop.xlane.xlu0 %539 }
 0x24f   :  { %v586_v63 = vsub.f32 %v1456_v17, %v540_v53  ;;  %v587_v58 = vsub.f32 %v1459_v18, %v540_v53 }
 0x251   :  { %v618_v57 = vmul.f32 1.442695, %v586_v63  ;;  %v620_v47 = vmul.f32 1.442695, %v587_v58 }
 0x252   :  { %v543_v51 = vpop.xlane.xlu0 %542 }
 0x253   :  { %1060 = vpow2.f32 %v618_v57  ;;  %v588_v46 = vsub.f32 %v1464_v30, %v543_v51  ;;  %v589_v8 = vsub.f32 %v1467_v31, %v543_v51 }
 0x254   :  { %1062 = vpow2.f32 %v620_v47 }
 0x255   :  { %v622_v50 = vmul.f32 1.442695, %v588_v46  ;;  %v624_v14 = vmul.f32 1.442695, %v589_v8 }
 0x256   :  { %v546_v52 = vpop.xlane.xlu1 %545 }
 0x257   :  { %1064 = vpow2.f32 %v622_v50  ;;  %v590_v59 = vsub.f32 %v1472_v43, %v546_v52  ;;  %v591_v41 = vsub.f32 %v1475_v48, %v546_v52 }
 0x258   :  { %1066 = vpow2.f32 %v624_v14 }
 0x259   :  { %v626_v17 = vmul.f32 1.442695, %v590_v59  ;;  %v628_v53 = vmul.f32 1.442695, %v591_v41 }
 0x25a   :  { %v549_v18 = vpop.xlane.xlu1 %548 }
 0x25b   :  { %1068 = vpow2.f32 %v626_v17  ;;  %v592_v57 = vsub.f32 %v1480_v60, %v549_v18  ;;  %v593_v30 = vsub.f32 %v1483_v61, %v549_v18 }
 0x25c   :  { %1070 = vpow2.f32 %v628_v53 }
 0x25d   :  { %v630_v51 = vmul.f32 1.442695, %v592_v57  ;;  %v632_v47 = vmul.f32 1.442695, %v593_v30 }
 0x25e   :  { %v552_v31 = vpop.xlane.xlu0 %551 }
 0x25f   :  { %v594_v63 = vsub.f32 %v1488_v3, %v552_v31  ;;  %v595_v58 = vsub.f32 %v1491_v4, %v552_v31  ;;  %1072 = vpow2.f32 %v630_v51 }
 0x260   :  { %v1061_v43 = vpop.eup %1060  ;;  %1074 = vpow2.f32 %v632_v47 }
 0x261   :  { %v1063_v46 = vpop.eup %1062  ;;  %v634_v48 = vmul.f32 1.442695, %v594_v63  ;;  %v636_v8 = vmul.f32 1.442695, %v595_v58  ;;  %v682_v60 = vmul.f32 %v1061_v43, %v1292_v19 }
 0x262   :  { %v555_v41 = vpop.xlane.xlu1 %554  ;;  %v762_v50 = vadd.f32 %v1063_v46, %v1061_v43  ;;  %v683_v61 = vmul.f32 %v1063_v46, %v1271_v11 }
 0x263   :  { %1076 = vpow2.f32 %v634_v48  ;;  %v596_v52 = vsub.f32 %v1496_v13, %v555_v41  ;;  %v597_v4 = vsub.f32 %v1499_v15, %v555_v41 }
 0x264   :  { %v1065_v14 = vpop.eup %1064  ;;  %1078 = vpow2.f32 %v636_v8  ;;  %763 = vadd.xlane.f32.xlu0 %v762_v50  ;;  %v714_v17 = vadd.f32 %v683_v61, %v682_v60 }
 0x265   :  { %v1067_v3 = vpop.eup %1066  ;;  %v684_v18 = vmul.f32 %v1065_v14, %v1294_v20  ;;  %v638_v51 = vmul.f32 1.442695, %v596_v52  ;;  %v640_v47 = vmul.f32 1.442695, %v597_v4 }
 0x266   :  { %v558_v59 = vpop.xlane.xlu0 %557  ;;  %v765_v53 = vadd.f32 %v1067_v3, %v1065_v14  ;;  %v685_v57 = vmul.f32 %v1067_v3, %v1273_v12 }
 0x267   :  { %v598_v19 = vsub.f32 %v1504_v25, %v558_v59  ;;  %v599_v11 = vsub.f32 %v1507_v36, %v558_v59 }
 0x268   :  { %v1069_v30 = vpop.eup %1068  ;;  %715 = vadd.xlane.f32.xlu0 %v714_v17  ;;  %766 = vadd.xlane.f32.xlu1 %v765_v53  ;;  %v717_v43 = vadd.f32 %v685_v57, %v684_v18 }
 0x269   :  { %v1071_v13 = vpop.eup %1070  ;;  %v642_v31 = vmul.f32 1.442695, %v598_v19  ;;  %v644_v63 = vmul.f32 1.442695, %v599_v11  ;;  %v686_v46 = vmul.f32 %v1069_v30, %v1307_v26 }
 0x26a   :  { %v561_v15 = vpop.xlane.xlu1 %560  ;;  %v768_v58 = vadd.f32 %v1071_v13, %v1069_v30  ;;  %v687_v20 = vmul.f32 %v1071_v13, %v1296_v21 }
 0x26b   :  { %1080 = vpow2.f32 %v642_v31  ;;  %v600_v12 = vsub.f32 %v1512_v54, %v561_v15  ;;  %v601_v25 = vsub.f32 %v1515_v55, %v561_v15 }
 0x26c   :  { %1082 = vpow2.f32 %v644_v63  ;;  %769 = vadd.xlane.f32.xlu0 %v768_v58  ;;  %718 = vadd.xlane.f32.xlu1 %v717_v43  ;;  %v1073_v48 = vpop.eup %1072  ;;  %v720_v50 = vadd.f32 %v687_v20, %v686_v46 }
 0x26d   :  { %1084 = vpow2.f32 %v638_v51  ;;  %v646_v36 = vmul.f32 1.442695, %v600_v12  ;;  %v648_v8 = vmul.f32 1.442695, %v601_v25  ;;  %v1075_v60 = vpop.eup %1074  ;;  %v688_v52 = vmul.f32 %v1073_v48, %v1309_v27 }
 0x26e   :  { %1086 = vpow2.f32 %v640_v47  ;;  %v564_v41 = vpop.xlane.xlu0 %563  ;;  %v771_v4 = vadd.f32 %v1075_v60, %v1073_v48  ;;  %v689_v17 = vmul.f32 %v1075_v60, %v1298_v22 }
 0x26f   :  { %v602_v26 = vsub.f32 %v1520_v5, %v564_v41  ;;  %v603_v21 = vsub.f32 %v1523_v9, %v564_v41  ;;  %1088 = vpow2.f32 %v646_v36 }
 0x270   :  { %v1077_v61 = vpop.eup %1076  ;;  %721 = vadd.xlane.f32.xlu1 %v720_v50  ;;  %1090 = vpow2.f32 %v648_v8  ;;  %v723_v19 = vadd.f32 %v689_v17, %v688_v52 }
 0x271   :  { %v1079_v54 = vpop.eup %1078  ;;  %v650_v55 = vmul.f32 1.442695, %v602_v26  ;;  %v652_v14 = vmul.f32 1.442695, %v603_v21  ;;  %v690_v27 = vmul.f32 %v1077_v61, %v1319_v32 }
 0x272   :  { %v567_v3 = vpop.xlane.xlu1 %566  ;;  %v774_v59 = vadd.f32 %v1079_v54, %v1077_v61  ;;  %v691_v11 = vmul.f32 %v1079_v54, %v1311_v28 }
 0x273   :  { %1092 = vpow2.f32 %v650_v55  ;;  %v604_v53 = vsub.f32 %v1528_v24, %v567_v3  ;;  %v605_v5 = vsub.f32 %v1531_v37, %v567_v3 }
 0x274   :  { %1094 = vpow2.f32 %v652_v14  ;;  %772 = vadd.xlane.f32.xlu1 %v771_v4  ;;  %775 = vadd.xlane.f32.xlu0 %v774_v59  ;;  %v726_v63 = vadd.f32 %v691_v11, %v690_v27 }
 0x275   :  { %v654_v9 = vmul.f32 1.442695, %v604_v53  ;;  %v656_v18 = vmul.f32 1.442695, %v605_v5 }
 0x276   :  { %v570_v57 = vpop.xlane.xlu0 %569 }
 0x277   :  { %1096 = vpow2.f32 %v654_v9  ;;  %v606_v30 = vsub.f32 %v1536_v2, %v570_v57  ;;  %v607_v22 = vsub.f32 %v1539_v1, %v570_v57 }
 0x278   :  { %v1081_v51 = vpop.eup %1080  ;;  %1098 = vpow2.f32 %v656_v18  ;;  %724 = vadd.xlane.f32.xlu1 %v723_v19 }
 0x279   :  { %v1083_v24 = vpop.eup %1082  ;;  %v658_v37 = vmul.f32 1.442695, %v606_v30  ;;  %v660_v13 = vmul.f32 1.442695, %v607_v22  ;;  %v694_v59 = vmul.f32 %v1081_v51, %v1331_v38 }
 0x27a   :  { %v1085_v47 = vpop.eup %1084  ;;  %v573_v31 = vpop.xlane.xlu1 %572  ;;  %v780_v15 = vadd.f32 %v1083_v24, %v1081_v51 }
 0x27b   :  { %v1087_v58 = vpop.eup %1086  ;;  %1100 = vpow2.f32 %v658_v37  ;;  %v608_v32 = vsub.f32 %v1544_v23, %v573_v31  ;;  %v609_v28 = vsub.f32 %v1547_v16, %v573_v31  ;;  %v692_v26 = vmul.f32 %v1085_v47, %v1321_v33 }
 0x27c   :  { %1102 = vpow2.f32 %v660_v13  ;;  %727 = vadd.xlane.f32.xlu1 %v726_v63  ;;  %781 = vadd.xlane.f32.xlu0 %v780_v15  ;;  %v1089_v43 = vpop.eup %1088  ;;  %v777_v20 = vadd.f32 %v1087_v58, %v1085_v47  ;;  %v693_v21 = vmul.f32 %v1087_v58, %v1313_v29  ;;  %v695_v33 = vmul.f32 %v1083_v24, %v1323_v34  ;;  %v1721_v47 = vld [vmem:[#allocation8_spill] sm:$0xff] }
 0x27d   :  { %v662_v2 = vmul.f32 1.442695, %v608_v32  ;;  %v664_v1 = vmul.f32 1.442695, %v609_v28  ;;  %v1091_v12 = vpop.eup %1090  ;;  %v696_v19 = vmul.f32 %v1089_v43, %v1333_v39  ;;  %v1722_v32 = vld [vmem:[#allocation12_spill] sm:$0xff]  ;;  %v1723_v28 = vld [vmem:[#allocation10_spill] sm:$0xff] }
 0x27e   :  { %v576_v46 = vpop.xlane.xlu0 %575  ;;  %v783_v50 = vadd.f32 %v1091_v12, %v1089_v43  ;;  %v729_v3 = vadd.f32 %v693_v21, %v692_v26  ;;  %v732_v18 = vadd.f32 %v695_v33, %v694_v59  ;;  %v697_v38 = vmul.f32 %v1091_v12, %v1325_v35  ;;  %v1724_v12 = vld [vmem:[#allocation16_spill] sm:$0xff]  ;;  %v1732_v33 = vld [vmem:[#allocation19_spill] sm:$0xff] }
 0x27f   :  { %1104 = vpow2.f32 %v662_v2  ;;  %v610_v25 = vsub.f32 %v1552_v0, %v576_v46  ;;  %v611_v36 = vsub.f32 %v1555_v49, %v576_v46  ;;  %v1728_v21 = vld [vmem:[#allocation20_spill] sm:$0xff] }
 0x280   :  { %v1093_v48 = vpop.eup %1092  ;;  %1106 = vpow2.f32 %v664_v1  ;;  %778 = vadd.xlane.f32.xlu1 %v777_v20  ;;  %v735_v22 = vadd.f32 %v697_v38, %v696_v19 }
 0x281   :  { %v1095_v23 = vpop.eup %1094  ;;  %v666_v8 = vmul.f32 1.442695, %v610_v25  ;;  %v668_v16 = vmul.f32 1.442695, %v611_v36  ;;  %v698_v24 = vmul.f32 %v1093_v48, %v1343_v44  ;;  %v1725_v25 = vld [vmem:[#allocation14_spill] sm:$0xff] }
 0x282   :  { %v579_v41 = vpop.xlane.xlu1 %578  ;;  %v786_v60 = vadd.f32 %v1095_v23, %v1093_v48  ;;  %v699_v39 = vmul.f32 %v1095_v23, %v1335_v40 }
 0x283   :  { %1108 = vpow2.f32 %v666_v8  ;;  %v612_v61 = vsub.f32 %v1560_v7, %v579_v41  ;;  %v613_v0 = vsub.f32 %v1563_v10, %v579_v41  ;;  %v1726_v8 = vld [vmem:[#allocation11_spill] sm:$0xff]  ;;  %v1727_v41 = vld [vmem:[#allocation9_spill] sm:$0xff] }
 0x284   :  { %v1097_v54 = vpop.eup %1096  ;;  %1110 = vpow2.f32 %v668_v16  ;;  %784 = vadd.xlane.f32.xlu1 %v783_v50  ;;  %787 = vadd.xlane.f32.xlu0 %v786_v60 }
 0x285   :  { %v1099_v49 = vpop.eup %1098  ;;  %v670_v55 = vmul.f32 1.442695, %v612_v61  ;;  %v672_v14 = vmul.f32 1.442695, %v613_v0  ;;  %v700_v13 = vmul.f32 %v1097_v54, %v1345_v45  ;;  %v1729_v0 = vld [vmem:[#allocation18_spill] sm:$0xff] }
 0x286   :  { %v582_v52 = vpop.xlane.xlu0 %581  ;;  %v789_v4 = vadd.f32 %v1099_v49, %v1097_v54  ;;  %v701_v31 = vmul.f32 %v1099_v49, %v1721_v47 }
 0x287   :  { %1112 = vpow2.f32 %v670_v55  ;;  %v614_v29 = vsub.f32 %v1568_v62, %v582_v52  ;;  %v615_v7 = vsub.f32 %v1571_v42, %v582_v52 }
 0x288   :  { %v1101_v10 = vpop.eup %1100  ;;  %1114 = vpow2.f32 %v672_v14  ;;  %730 = vadd.xlane.f32.xlu1 %v729_v3  ;;  %790 = vadd.xlane.f32.xlu0 %v789_v4  ;;  %v741_v58 = vadd.f32 %v701_v31, %v700_v13  ;;  %v1730_v14 = vld [vmem:[#allocation15_spill] sm:$0xff]  ;;  %v1731_v3 = vld [vmem:[#allocation13_spill] sm:$0xff] }
 0x289   :  { %v1103_v17 = vpop.eup %1102  ;;  %v674_v53 = vmul.f32 1.442695, %v614_v29  ;;  %v676_v5 = vmul.f32 1.442695, %v615_v7  ;;  %v702_v16 = vmul.f32 %v1101_v10, %v1726_v8  ;;  %v1733_v7 = vld [vmem:[#allocation17_spill] sm:$0xff] }
 0x28a   :  { %v585_v9 = vpop.xlane.xlu1 %584  ;;  %v792_v57 = vadd.f32 %v1103_v17, %v1101_v10  ;;  %v703_v50 = vmul.f32 %v1103_v17, %v1727_v41 }
 0x28b   :  { %1116 = vpow2.f32 %v674_v53  ;;  %v616_v34 = vsub.f32 %v1576_v56, %v585_v9  ;;  %v617_v62 = vsub.f32 %v1579_v6, %v585_v9  ;;  %v738_v6 = vadd.f32 %v699_v39, %v698_v24 }
 0x28c   :  { %v1105_v42 = vpop.eup %1104  ;;  %1118 = vpow2.f32 %v676_v5  ;;  %733 = vadd.xlane.f32.xlu1 %v732_v18  ;;  %793 = vadd.xlane.f32.xlu0 %v792_v57  ;;  %v744_v55 = vadd.f32 %v703_v50, %v702_v16 }
 0x28d   :  { %v1107_v27 = vpop.eup %1106  ;;  %v678_v11 = vmul.f32 1.442695, %v616_v34  ;;  %v680_v30 = vmul.f32 1.442695, %v617_v62  ;;  %v704_v40 = vmul.f32 %v1105_v42, %v1722_v32 }
 0x28e   :  { %v795_v51 = vadd.f32 %v1107_v27, %v1105_v42  ;;  %v705_v2 = vmul.f32 %v1107_v27, %v1723_v28 }
 0x28f   :  { %1120 = vpow2.f32 %v678_v11 }
 0x290   :  { %v1109_v35 = vpop.eup %1108  ;;  %1122 = vpow2.f32 %v680_v30  ;;  %736 = vadd.xlane.f32.xlu1 %v735_v22  ;;  %796 = vadd.xlane.f32.xlu0 %v795_v51  ;;  %v747_v46 = vadd.f32 %v705_v2, %v704_v40  ;;  %v1734_v22 = vld [vmem:[#allocation21_spill] sm:$0xff] }
 0x291   :  { %v1111_v56 = vpop.eup %1110  ;;  %v706_v52 = vmul.f32 %v1109_v35, %v1730_v14  ;;  %v844_v51 = vadd.s32 8, %v1734_v22  ;;  %v845_v13 = vadd.s32 16, %v1734_v22  ;;  %v850_v14 = vadd.s32 56, %v1734_v22 }
 0x292   :  { %v798_v37 = vadd.f32 %v1111_v56, %v1109_v35  ;;  %v707_v4 = vmul.f32 %v1111_v56, %v1731_v3 }
 0x294   :  { %v1113_v63 = vpop.eup %1112  ;;  %739 = vadd.xlane.f32.xlu1 %v738_v6  ;;  %799 = vadd.xlane.f32.xlu0 %v798_v37  ;;  %v750_v59 = vadd.f32 %v707_v4, %v706_v52  ;;  %v1735_v6 = vlaneseq }
 0x295   :  { %v1115_v15 = vpop.eup %1114  ;;  %v708_v45 = vmul.f32 %v1113_v63, %v1724_v12 }
 0x296   :  { %v801_v44 = vadd.f32 %v1115_v15, %v1113_v63  ;;  %v709_v36 = vmul.f32 %v1115_v15, %v1725_v25  ;;  %v1649_v37 = vand.u32 127, %v1735_v6  ;;  %v846_v63 = vadd.s32 24, %v1734_v22 }
 0x297   :  { %v847_v25 = vadd.s32 32, %v1734_v22  ;;  %v855_v6 = vadd.s32 96, %v1734_v22 }
 0x298   :  { %v1117_v1 = vpop.eup %1116  ;;  %742 = vadd.xlane.f32.xlu1 %v741_v58  ;;  %802 = vadd.xlane.f32.xlu0 %v801_v44  ;;  %v753_v60 = vadd.f32 %v709_v36, %v708_v45  ;;  %vm862_vm1 = vcmp.eq.s32.totalorder %v844_v51, %v1649_v37  ;;  %vm861_vm2 = vcmp.eq.s32.totalorder %v1734_v22, %v1649_v37  ;;  %v848_v36 = vadd.s32 40, %v1734_v22 }
 0x299   :  { %v1119_v43 = vpop.eup %1118  ;;  %v710_v29 = vmul.f32 %v1117_v1, %v1732_v33  ;;  %vm863_vm3 = vcmp.eq.s32.totalorder %v845_v13, %v1649_v37  ;;  %vm864_vm4 = vcmp.eq.s32.totalorder %v846_v63, %v1649_v37  ;;  %vm865_vm5 = vcmp.eq.s32.totalorder %v847_v25, %v1649_v37 }
 0x29a   :  { %v804_v20 = vadd.f32 %v1119_v43, %v1117_v1  ;;  %v711_v10 = vmul.f32 %v1119_v43, %v1733_v7  ;;  %vm866_vm6 = vcmp.eq.s32.totalorder %v848_v36, %v1649_v37  ;;  %vm868_vm8 = vcmp.eq.s32.totalorder %v850_v14, %v1649_v37 }
 0x29b   :  { %vm873_vm13 = vcmp.eq.s32.totalorder %v855_v6, %v1649_v37 }
 0x29c   :  { %v1121_v48 = vpop.eup %1120  ;;  %748 = vadd.xlane.f32.xlu1 %v747_v46  ;;  %805 = vadd.xlane.f32.xlu0 %v804_v20  ;;  %v756_v17 = vadd.f32 %v711_v10, %v710_v29  ;;  %v851_v29 = vadd.s32 64, %v1734_v22 }
 0x29d   :  { %v1123_v23 = vpop.eup %1122  ;;  %v712_v61 = vmul.f32 %v1121_v48, %v1728_v21 }
 0x29e   :  { %v807_v26 = vadd.f32 %v1123_v23, %v1121_v48  ;;  %v713_v54 = vmul.f32 %v1123_v23, %v1729_v0  ;;  %vm869_vm9 = vcmp.eq.s32.totalorder %v851_v29, %v1649_v37 }
 0x2a0   :  { %754 = vadd.xlane.f32.xlu1 %v753_v60  ;;  %808 = vadd.xlane.f32.xlu0 %v807_v26  ;;  %v759_v49 = vadd.f32 %v713_v54, %v712_v61  ;;  %v849_v26 = vadd.s32 48, %v1734_v22 }
 0x2a2   :  { %vm867_vm7 = vcmp.eq.s32.totalorder %v849_v26, %v1649_v37 }
 0x2a4   :  { %760 = vadd.xlane.f32.xlu1 %v759_v49  ;;  %745 = vadd.xlane.f32.xlu0 %v744_v55 }
 0x2a8   :  { %751 = vadd.xlane.f32.xlu0 %v750_v59 }
 0x2ac   :  { %757 = vadd.xlane.f32.xlu0 %v756_v17 }
 0x2ed   :  { %v764_v5 = vpop.xlane.xlu0 %763 }
 0x2f1   :  { %v767_v53 = vpop.xlane.xlu1 %766  ;;  %v716_v18 = vpop.xlane.xlu0 %715 }
 0x2f2   :  { %1124 = vrcp.f32 %v767_v53  ;;  %v852_v53 = vadd.s32 72, %v1734_v22 }
 0x2f3   :  { %1126 = vrcp.f32 %v764_v5 }
 0x2f4   :  { %vm870_vm10 = vcmp.eq.s32.totalorder %v852_v53, %v1649_v37 }
 0x2f5   :  { %v719_v9 = vpop.xlane.xlu1 %718  ;;  %v770_v38 = vpop.xlane.xlu0 %769 }
 0x2f6   :  { %1128 = vrcp.f32 %v770_v38 }
 0x2f9   :  { %v722_v57 = vpop.xlane.xlu1 %721 }
 0x2fd   :  { %v773_v19 = vpop.xlane.xlu1 %772  ;;  %v776_v62 = vpop.xlane.xlu0 %775 }
 0x2fe   :  { %1130 = vrcp.f32 %v773_v19 }
 0x2ff   :  { %1132 = vrcp.f32 %v776_v62  ;;  %v1125_v30 = vpop.eup %1124 }
 0x300   :  { %v1127_v35 = vpop.eup %1126  ;;  %v813_v47 = vmul.f32 %v1125_v30, %v719_v9  ;;  %v854_v30 = vadd.s32 88, %v1734_v22 }
 0x301   :  { %v725_v34 = vpop.xlane.xlu1 %724  ;;  %v811_v44 = vmul.f32 %v1127_v35, %v716_v18 }
 0x302   :  { %v878_v40 = vsel %vm862_vm1, %v813_v47, 0.0  ;;  %vm872_vm12 = vcmp.eq.s32.totalorder %v854_v30, %v1649_v37 }
 0x303   :  { %v1129_v56 = vpop.eup %1128  ;;  %v877_v46 = vsel %vm861_vm2, %v811_v44, 0.0 }
 0x304   :  { %v815_v32 = vmul.f32 %v1129_v56, %v722_v57  ;;  %v893_v45 = vadd.f32 %v878_v40, %v877_v46 }
 0x305   :  { %v728_v42 = vpop.xlane.xlu1 %727  ;;  %v782_v27 = vpop.xlane.xlu0 %781 }
 0x306   :  { %v879_v20 = vsel %vm863_vm3, %v815_v32, 0.0 }
 0x307   :  { %v894_v23 = vadd.f32 %v893_v45, %v879_v20  ;;  %v858_v20 = vadd.s32 120, %v1734_v22 }
 0x309   :  { %v779_v11 = vpop.xlane.xlu1 %778  ;;  %vm876_vm0 = vcmp.eq.s32.totalorder %v858_v20, %v1649_v37 }
 0x30a   :  { %1134 = vrcp.f32 %v779_v11 }
 0x30b   :  { %v1131_v31 = vpop.eup %1130  ;;  %1136 = vrcp.f32 %v782_v27 }
 0x30c   :  { %v817_v28 = vmul.f32 %v1131_v31, %v725_v34  ;;  %v1133_v43 = vpop.eup %1132 }
 0x30d   :  { %v785_v24 = vpop.xlane.xlu1 %784  ;;  %v788_v39 = vpop.xlane.xlu0 %787  ;;  %v819_v41 = vmul.f32 %v1133_v43, %v728_v42  ;;  %v853_v42 = vadd.s32 80, %v1734_v22 }
 0x30e   :  { %1138 = vrcp.f32 %v785_v24  ;;  %v880_v48 = vsel %vm864_vm4, %v817_v28, 0.0 }
 0x30f   :  { %1140 = vrcp.f32 %v788_v39  ;;  %v895_v60 = vadd.f32 %v894_v23, %v880_v48  ;;  %v881_v0 = vsel %vm865_vm5, %v819_v41, 0.0  ;;  %vm871_vm11 = vcmp.eq.s32.totalorder %v853_v42, %v1649_v37 }
 0x311   :  { %v731_v15 = vpop.xlane.xlu1 %730  ;;  %v791_v58 = vpop.xlane.xlu0 %790  ;;  %v896_v55 = vadd.f32 %v895_v60, %v881_v0 }
 0x312   :  { %1142 = vrcp.f32 %v791_v58 }
 0x315   :  { %v734_v2 = vpop.xlane.xlu1 %733  ;;  %v794_v1 = vpop.xlane.xlu0 %793 }
 0x317   :  { %v1135_v12 = vpop.eup %1134 }
 0x318   :  { %v821_v50 = vmul.f32 %v1135_v12, %v731_v15  ;;  %v1137_v61 = vpop.eup %1136  ;;  %v856_v15 = vadd.s32 104, %v1734_v22 }
 0x319   :  { %v737_v8 = vpop.xlane.xlu1 %736  ;;  %v797_v16 = vpop.xlane.xlu0 %796  ;;  %v823_v3 = vmul.f32 %v1137_v61, %v734_v2  ;;  %v857_v2 = vadd.s32 112, %v1734_v22 }
 0x31a   :  { %v882_v54 = vsel %vm866_vm6, %v821_v50, 0.0  ;;  %1144 = vrcp.f32 %v797_v16  ;;  %vm874_vm14 = vcmp.eq.s32.totalorder %v856_v15, %v1649_v37 }
 0x31b   :  { %v1139_v49 = vpop.eup %1138  ;;  %1146 = vrcp.f32 %v794_v1  ;;  %v897_v4 = vadd.f32 %v896_v55, %v882_v54  ;;  %v883_v7 = vsel %vm867_vm7, %v823_v3, 0.0  ;;  %vm875_vm15 = vcmp.eq.s32.totalorder %v857_v2, %v1649_v37 }
 0x31c   :  { %v825_v33 = vmul.f32 %v1139_v49, %v737_v8  ;;  %v1141_v10 = vpop.eup %1140 }
 0x31d   :  { %v800_v21 = vpop.xlane.xlu0 %799  ;;  %v740_v52 = vpop.xlane.xlu1 %739  ;;  %v898_v17 = vadd.f32 %v897_v4, %v883_v7 }
 0x31e   :  { %v884_v18 = vsel %vm868_vm8, %v825_v33, 0.0  ;;  %v827_v57 = vmul.f32 %v1141_v10, %v740_v52 }
 0x31f   :  { %v1143_v19 = vpop.eup %1142  ;;  %v899_v34 = vadd.f32 %v898_v17, %v884_v18 }
 0x320   :  { %v885_v27 = vsel %vm869_vm9, %v827_v57, 0.0 }
 0x321   :  { %v803_v59 = vpop.xlane.xlu0 %802  ;;  %v743_v5 = vpop.xlane.xlu1 %742  ;;  %v900_v35 = vadd.f32 %v899_v34, %v885_v27 }
 0x322   :  { %1148 = vrcp.f32 %v803_v59  ;;  %v829_v38 = vmul.f32 %v1143_v19, %v743_v5 }
 0x323   :  { %1150 = vrcp.f32 %v800_v21 }
 0x324   :  { %v886_v24 = vsel %vm870_vm10, %v829_v38, 0.0 }
 0x325   :  { %v806_v9 = vpop.xlane.xlu0 %805  ;;  %v749_v51 = vpop.xlane.xlu1 %748  ;;  %v901_v63 = vadd.f32 %v900_v35, %v886_v24 }
 0x326   :  { %1152 = vrcp.f32 %v806_v9 }
 0x327   :  { %v1145_v11 = vpop.eup %1144 }
 0x328   :  { %v1147_v39 = vpop.eup %1146  ;;  %v833_v13 = vmul.f32 %v1145_v11, %v749_v51 }
 0x329   :  { %v809_v62 = vpop.xlane.xlu0 %808  ;;  %v755_v32 = vpop.xlane.xlu1 %754 }
 0x32a   :  { %1154 = vrcp.f32 %v809_v62  ;;  %v888_v1 = vsel %vm872_vm12, %v833_v13, 0.0 }
 0x32d   :  { %v746_v56 = vpop.xlane.xlu0 %745  ;;  %v761_v41 = vpop.xlane.xlu1 %760 }
 0x32e   :  { %v831_v47 = vmul.f32 %v1147_v39, %v746_v56 }
 0x32f   :  { %v1149_v31 = vpop.eup %1148 }
 0x330   :  { %v887_v58 = vsel %vm871_vm11, %v831_v47, 0.0  ;;  %v1151_v44 = vpop.eup %1150  ;;  %v837_v43 = vmul.f32 %v1149_v31, %v755_v32 }
 0x331   :  { %v902_v40 = vadd.f32 %v901_v63, %v887_v58  ;;  %v752_v28 = vpop.xlane.xlu0 %751 }
 0x332   :  { %v835_v46 = vmul.f32 %v1151_v44, %v752_v28  ;;  %v890_v23 = vsel %vm874_vm14, %v837_v43, 0.0 }
 0x333   :  { %v903_v12 = vadd.f32 %v902_v40, %v888_v1  ;;  %v1153_v25 = vpop.eup %1152 }
 0x334   :  { %v889_v45 = vsel %vm873_vm13, %v835_v46, 0.0 }
 0x335   :  { %v904_v36 = vadd.f32 %v903_v12, %v889_v45  ;;  %v758_v48 = vpop.xlane.xlu0 %757 }
 0x336   :  { %v839_v8 = vmul.f32 %v1153_v25, %v758_v48 }
 0x337   :  { %v1155_v16 = vpop.eup %1154  ;;  %v905_v50 = vadd.f32 %v904_v36, %v890_v23 }
 0x338   :  { %v841_v60 = vmul.f32 %v1155_v16, %v761_v41  ;;  %v891_v26 = vsel %vm875_vm15, %v839_v8, 0.0 }
 0x339   :  { %v906_v21 = vadd.f32 %v905_v50, %v891_v26 }
 0x33a   :  { %v892_v61 = vsel %vm876_vm0, %v841_v60, 0.0 }
 0x33b   :  { %v907_v0 = vadd.f32 %v906_v21, %v892_v61 }
 0x33d   :  { %v908_v22 = vrot.slane %v907_v0, 4 }
 0x33f   :  { %v909_v54 = vadd.f32 %v908_v22, %v907_v0 }
 0x341   :  { %v910_v49 = vrot.slane %v909_v54, 2 }
 0x343   :  { %v911_v55 = vadd.f32 %v910_v49, %v909_v54 }
 0x345   :  { %v912_v14 = vrot.slane %v911_v55, 1 }
 0x347   :  { %v913_v52 = vadd.f32 %v912_v14, %v911_v55 }
 0x349   :  { %914 = vst [vmem:[#allocation5] sm:$0x1] %v913_v52 }
 0x34a   :  { %1187 = shalt.err (!%p1184_p9)
}
 0x34b   :  { %924 = dma.vmem_to_hbm [thread:$0]  %s922_s22, 16, %s1690_s5, [#allocation4]  }
 0x34c   :  { %1198 = dma.done.wait [#allocation4], 16  }
 0x34d   :  { %1199 = vsyncadd [#allocation4], 4294967280 }
 0x34e   :  { %928 = vsyncpa [#allocation3], 1 }
 0x34f   :  { %929 = vsyncpa [#allocation4], 1 }

</bundles_post_ra>
